<compile_context>
chip_gen: v7x
topology: tpu7x:2x2x1
jax: 0.10.0
libtpu: 0.0.40
codegen_flags: <defaults>
</compile_context>

<pallas_src>
import functools

import jax
import jax.numpy as jnp
from jax.experimental import pallas as pl
from jax.experimental.pallas import tpu as pltpu


# ------------------------------ Pallas kernel --------------------------------

def _attention_fused_kernel(x_ref, qkv_w_ref, out_w_ref, out_b_ref, o_ref, *,
                            heads):
    # x_ref:     (bb, N, D)   fp32 activations for this batch block
    # qkv_w_ref: (D, 3D)      bf16, (in, out) layout, Q columns pre-scaled
    # out_w_ref: (heads, d_head, D) bf16, (in, out) layout grouped per head
    # out_b_ref: (1, D)       fp32
    # o_ref:     (bb, N, D)   fp32
    bb, N, D = x_ref.shape
    dh = D // heads

    qkv_w = qkv_w_ref[...]                                   # (D, 3D) bf16
    out_w = out_w_ref[...]                                   # (heads, dh, D) bf16
    bias_nd = jnp.broadcast_to(out_b_ref[...], (N, D))       # hoisted (no re-bcast)

    for b in range(bb):                                      # static, unrolled
        xb = x_ref[b].astype(jnp.bfloat16)                   # (N, D)
        # Fused QKV projection, no bias.  Column layout matches
        # rearrange 'b n (qkv h d) -> qkv b h n d':
        #   q cols [0, D), k cols [D, 2D), v cols [2D, 3D); head h at h*dh.
        qkv = jnp.dot(xb, qkv_w, preferred_element_type=jnp.float32)   # (N, 3D) f32

        acc = bias_nd                                        # fp32 accumulator
        for h in range(heads):                               # static, unrolled
            q = qkv[:, h * dh:(h + 1) * dh].astype(jnp.bfloat16)
            k = qkv[:, D + h * dh:D + (h + 1) * dh].astype(jnp.bfloat16)
            v = qkv[:, 2 * D + h * dh:2 * D + (h + 1) * dh].astype(jnp.bfloat16)

            # Scale already folded into the Q weight columns.
            dots = jax.lax.dot_general(
                q, k, (((1,), (1,)), ((), ())),
                preferred_element_type=jnp.float32)          # (N, N) f32

            # Exact softmax in fp32 (max-subtracted; exact reciprocal).
            m = jnp.max(dots, axis=-1, keepdims=True)
            e = jnp.exp(dots - m)
            l = jnp.sum(e, axis=-1, keepdims=True)
            attn = (e * pl.reciprocal(l, approx=False)).astype(jnp.bfloat16)

            pv = jnp.dot(attn, v, preferred_element_type=jnp.float32)  # (N, dh)
            # Per-head output projection == concat-then-project, without the
            # cross-lane concat.  out_w[h] is a clean leading-axis index.
            acc = acc + jnp.dot(pv.astype(jnp.bfloat16), out_w[h],
                                preferred_element_type=jnp.float32)    # (N, D)

        o_ref[b] = acc.astype(o_ref.dtype)                   # one (N, D) store


# ------------------------------ param prep (one-time) -------------------------

def prepare_params(qkv_w, out_w, out_b, *, dim, heads):
    """One-time, outside the hot path. Torch layouts in, kernel layouts out.

    qkv_w: (3*dim, dim)  out_w: (dim, dim)  out_b: (dim,)  (nn.Linear layouts)
    """
    dh = dim // heads
    scale = dim ** (-0.5)                       # full dim, as in the module
    qkv_w_io = jnp.asarray(qkv_w, jnp.float32).T             # (D, 3D), (in, out)
    qkv_w_io = qkv_w_io.at[:, :dim].multiply(scale)          # fold scale into Q
    qkv_w_p = qkv_w_io.astype(jnp.bfloat16)
    out_w_p = jnp.asarray(out_w, jnp.float32).T.reshape(heads, dh, dim) \
                 .astype(jnp.bfloat16)                       # (heads, dh, D)
    out_b_p = jnp.asarray(out_b, jnp.float32).reshape(1, dim)
    return qkv_w_p, out_w_p, out_b_p


# ------------------------------ wrapper ---------------------------------------

def attention_forward(x, qkv_w_p, out_w_p, out_b_p, *, heads, batch_blocks=None):
    """x: (B, N, D) fp32.  Other args from prepare_params()."""
    B, N, D = x.shape
    dh = D // heads
    if batch_blocks is None:
        # One grid step per v7x TensorCore; costs only one extra tiny step on
        # single-TC v5e/v6e versus a fully collapsed grid.
        batch_blocks = 2 if (B % 2 == 0 and B >= 2) else 1
    assert B % batch_blocks == 0
    bb = B // batch_blocks

    kern = functools.partial(_attention_fused_kernel, heads=heads)
    return pl.pallas_call(
        kern,
        out_shape=jax.ShapeDtypeStruct((B, N, D), jnp.float32),
        grid=(batch_blocks,),
        in_specs=[
            pl.BlockSpec((bb, N, D), lambda g: (g, 0, 0)),        # tokens
            pl.BlockSpec((D, 3 * D), lambda g: (0, 0)),           # qkv weight
            pl.BlockSpec((heads, dh, D), lambda g: (0, 0, 0)),    # out weight
            pl.BlockSpec((1, D), lambda g: (0, 0)),               # out bias
        ],
        out_specs=pl.BlockSpec((bb, N, D), lambda g: (g, 0, 0)),
        compiler_params=pltpu.CompilerParams(
            dimension_semantics=("parallel",)),
    )(x, qkv_w_p, out_w_p, out_b_p)


# ----------------------- pure-JAX reference (for checking) --------------------

def attention_ref(x, qkv_w, out_w, out_b, *, heads):
    b, n, d = x.shape
    scale = d ** (-0.5)
    dh = d // heads
    qkv = x @ qkv_w.T                                           # (b, n, 3d)
    qkv = qkv.reshape(b, n, 3, heads, dh)
    q = qkv[:, :, 0].transpose(0, 2, 1, 3)                      # (b, h, n, dh)
    k = qkv[:, :, 1].transpose(0, 2, 1, 3)
    v = qkv[:, :, 2].transpose(0, 2, 1, 3)
    dots = jnp.einsum('bhid,bhjd->bhij', q, k) * scale
    attn = jax.nn.softmax(dots, axis=-1)
    out = jnp.einsum('bhij,bhjd->bhid', attn, v)
    out = out.transpose(0, 2, 1, 3).reshape(b, n, d)
    return out @ out_w.T + out_b


# --------------------------------- main ----------------------------------------

if __name__ == "__main__":
    batch, seq, dim, heads = 2, 16, 32, 4

    key = jax.random.PRNGKey(0)
    k_x, k_qkv, k_ow, k_ob = jax.random.split(key, 4)
    x = jax.random.normal(k_x, (batch, seq, dim), jnp.float32)
    # torch nn.Linear layout: weight (out_features, in_features)
    qkv_w = jax.random.normal(k_qkv, (3 * dim, dim), jnp.float32) * (dim ** -0.5)
    out_w = jax.random.normal(k_ow, (dim, dim), jnp.float32) * (dim ** -0.5)
    out_b = jax.random.normal(k_ob, (dim,), jnp.float32) * 0.02

    # One-time layout/scale prep, outside the jitted hot path.
    qkv_w_p, out_w_p, out_b_p = prepare_params(qkv_w, out_w, out_b,
                                               dim=dim, heads=heads)

    fwd = jax.jit(functools.partial(attention_forward, heads=heads))
    out = fwd(x, qkv_w_p, out_w_p, out_b_p)
    jax.block_until_ready(out)

    ref = attention_ref(x, qkv_w, out_w, out_b, heads=heads)
    assert out.shape == (batch, seq, dim)
    assert out.dtype == jnp.float32
    err = float(jnp.max(jnp.abs(out - ref)))
    # bf16 MXU operands (fp32 accumulation + fp32 softmax) vs an all-fp32
    # reference -> tolerance sized for bf16 rounding, not for approximations.
    assert jnp.allclose(out, ref, rtol=3e-2, atol=3e-2), err
    print("KERNEL_OK")
</pallas_src>

<mosaic_0001>
module attributes {stable_mosaic.version = 11 : i64} {
  func.func @_attention_fused_kernel(%arg0: i32, %arg1: memref<1x16x32xf32, #tpu.memory_space<vmem>>, %arg2: memref<32x96xbf16, #tpu.memory_space<vmem>>, %arg3: memref<4x8x32xbf16, #tpu.memory_space<vmem>>, %arg4: memref<1x32xf32, #tpu.memory_space<vmem>>, %arg5: memref<1x16x32xf32, #tpu.memory_space<vmem>>) attributes {dimension_semantics = [#tpu.dimension_semantics<parallel>], iteration_bounds = array<i64: 2>, scalar_prefetch = 0 : i64, scratch_operands = 0 : i64, tpu.core_type = #tpu.core_type<tc>, window_params = [{transform_indices = @transform_0, window_bounds = array<i64: 1, 16, 32>}, {pipeline_mode = #tpu.pipeline_mode<synchronous>, transform_indices = @transform_1, window_bounds = array<i64: 32, 96>}, {pipeline_mode = #tpu.pipeline_mode<synchronous>, transform_indices = @transform_2, window_bounds = array<i64: 4, 8, 32>}, {pipeline_mode = #tpu.pipeline_mode<synchronous>, transform_indices = @transform_3, window_bounds = array<i64: 1, 32>}, {transform_indices = @transform_4, window_bounds = array<i64: 1, 16, 32>}]} {
    %c0 = arith.constant 0 : index
    %c0_0 = arith.constant 0 : index
    %0 = vector.load %arg2[%c0, %c0_0] : memref<32x96xbf16, #tpu.memory_space<vmem>>, vector<32x96xbf16>
    %c0_1 = arith.constant 0 : index
    %c0_2 = arith.constant 0 : index
    %c0_3 = arith.constant 0 : index
    %1 = vector.load %arg3[%c0_1, %c0_2, %c0_3] : memref<4x8x32xbf16, #tpu.memory_space<vmem>>, vector<4x8x32xbf16>
    %c0_4 = arith.constant 0 : index
    %c0_5 = arith.constant 0 : index
    %2 = vector.load %arg4[%c0_4, %c0_5] : memref<1x32xf32, #tpu.memory_space<vmem>>, vector<1x32xf32>
    %3 = vector.shape_cast %2 : vector<1x32xf32> to vector<1x32xf32>
    %4 = vector.broadcast %3 : vector<1x32xf32> to vector<16x32xf32>
    %c0_6 = arith.constant 0 : index
    %c0_7 = arith.constant 0 : index
    %c0_8 = arith.constant 0 : index
    %5 = vector.load %arg1[%c0_6, %c0_7, %c0_8] : memref<1x16x32xf32, #tpu.memory_space<vmem>>, vector<1x16x32xf32>
    %6 = vector.shape_cast %5 : vector<1x16x32xf32> to vector<16x32xf32>
    %7 = arith.truncf %6 : vector<16x32xf32> to vector<16x32xbf16>
    %cst = arith.constant dense<0.000000e+00> : vector<16x96xf32>
    %8 = tpu.matmul %7, %0, %cst {dimension_numbers = #tpu.dot_dimension_numbers<[1], [0], [0], [1], [0, 0, 1, 1], [], []>} : vector<16x32xbf16>, vector<32x96xbf16>, vector<16x96xf32> -> vector<16x96xf32>
    %9 = vector.extract_strided_slice %8 {offsets = [0, 0], sizes = [16, 8], strides = [1, 1]} : vector<16x96xf32> to vector<16x8xf32>
    %10 = arith.truncf %9 : vector<16x8xf32> to vector<16x8xbf16>
    %11 = vector.extract_strided_slice %8 {offsets = [0, 32], sizes = [16, 8], strides = [1, 1]} : vector<16x96xf32> to vector<16x8xf32>
    %12 = arith.truncf %11 : vector<16x8xf32> to vector<16x8xbf16>
    %13 = vector.extract_strided_slice %8 {offsets = [0, 64], sizes = [16, 8], strides = [1, 1]} : vector<16x96xf32> to vector<16x8xf32>
    %14 = arith.truncf %13 : vector<16x8xf32> to vector<16x8xbf16>
    %cst_9 = arith.constant dense<0.000000e+00> : vector<16x16xf32>
    %15 = tpu.matmul %10, %12, %cst_9 {dimension_numbers = #tpu.dot_dimension_numbers<[1], [1], [0], [0], [0, 0, 1, 0], [], []>} : vector<16x8xbf16>, vector<16x8xbf16>, vector<16x16xf32> -> vector<16x16xf32>
    %cst_10 = arith.constant dense<0xFF800000> : vector<16xf32>
    %16 = vector.multi_reduction <maximumf>, %15, %cst_10 [1] : vector<16x16xf32> to vector<16xf32>
    %17 = vector.shape_cast %16 : vector<16xf32> to vector<16x1xf32>
    %18 = vector.broadcast %17 : vector<16x1xf32> to vector<16x16xf32>
    %19 = arith.subf %15, %18 : vector<16x16xf32>
    %20 = math.exp %19 : vector<16x16xf32>
    %cst_11 = arith.constant dense<0.000000e+00> : vector<16xf32>
    %21 = vector.multi_reduction <add>, %20, %cst_11 [1] : vector<16x16xf32> to vector<16xf32>
    %22 = vector.shape_cast %21 : vector<16xf32> to vector<16x1xf32>
    %23 = tpu.reciprocal %22 : vector<16x1xf32> -> vector<16x1xf32>
    %24 = vector.broadcast %23 : vector<16x1xf32> to vector<16x16xf32>
    %25 = arith.mulf %20, %24 : vector<16x16xf32>
    %26 = arith.truncf %25 : vector<16x16xf32> to vector<16x16xbf16>
    %cst_12 = arith.constant dense<0.000000e+00> : vector<16x8xf32>
    %27 = tpu.matmul %26, %14, %cst_12 {dimension_numbers = #tpu.dot_dimension_numbers<[1], [0], [0], [1], [0, 0, 1, 1], [], []>} : vector<16x16xbf16>, vector<16x8xbf16>, vector<16x8xf32> -> vector<16x8xf32>
    %28 = arith.truncf %27 : vector<16x8xf32> to vector<16x8xbf16>
    %29 = vector.extract_strided_slice %1 {offsets = [0, 0, 0], sizes = [1, 8, 32], strides = [1, 1, 1]} : vector<4x8x32xbf16> to vector<1x8x32xbf16>
    %30 = vector.shape_cast %29 : vector<1x8x32xbf16> to vector<8x32xbf16>
    %cst_13 = arith.constant dense<0.000000e+00> : vector<16x32xf32>
    %31 = tpu.matmul %28, %30, %cst_13 {dimension_numbers = #tpu.dot_dimension_numbers<[1], [0], [0], [1], [0, 0, 1, 1], [], []>} : vector<16x8xbf16>, vector<8x32xbf16>, vector<16x32xf32> -> vector<16x32xf32>
    %32 = arith.addf %4, %31 : vector<16x32xf32>
    %33 = vector.extract_strided_slice %8 {offsets = [0, 8], sizes = [16, 8], strides = [1, 1]} : vector<16x96xf32> to vector<16x8xf32>
    %34 = arith.truncf %33 : vector<16x8xf32> to vector<16x8xbf16>
    %35 = vector.extract_strided_slice %8 {offsets = [0, 40], sizes = [16, 8], strides = [1, 1]} : vector<16x96xf32> to vector<16x8xf32>
    %36 = arith.truncf %35 : vector<16x8xf32> to vector<16x8xbf16>
    %37 = vector.extract_strided_slice %8 {offsets = [0, 72], sizes = [16, 8], strides = [1, 1]} : vector<16x96xf32> to vector<16x8xf32>
    %38 = arith.truncf %37 : vector<16x8xf32> to vector<16x8xbf16>
    %cst_14 = arith.constant dense<0.000000e+00> : vector<16x16xf32>
    %39 = tpu.matmul %34, %36, %cst_14 {dimension_numbers = #tpu.dot_dimension_numbers<[1], [1], [0], [0], [0, 0, 1, 0], [], []>} : vector<16x8xbf16>, vector<16x8xbf16>, vector<16x16xf32> -> vector<16x16xf32>
    %cst_15 = arith.constant dense<0xFF800000> : vector<16xf32>
    %40 = vector.multi_reduction <maximumf>, %39, %cst_15 [1] : vector<16x16xf32> to vector<16xf32>
    %41 = vector.shape_cast %40 : vector<16xf32> to vector<16x1xf32>
    %42 = vector.broadcast %41 : vector<16x1xf32> to vector<16x16xf32>
    %43 = arith.subf %39, %42 : vector<16x16xf32>
    %44 = math.exp %43 : vector<16x16xf32>
    %cst_16 = arith.constant dense<0.000000e+00> : vector<16xf32>
    %45 = vector.multi_reduction <add>, %44, %cst_16 [1] : vector<16x16xf32> to vector<16xf32>
    %46 = vector.shape_cast %45 : vector<16xf32> to vector<16x1xf32>
    %47 = tpu.reciprocal %46 : vector<16x1xf32> -> vector<16x1xf32>
    %48 = vector.broadcast %47 : vector<16x1xf32> to vector<16x16xf32>
    %49 = arith.mulf %44, %48 : vector<16x16xf32>
    %50 = arith.truncf %49 : vector<16x16xf32> to vector<16x16xbf16>
    %cst_17 = arith.constant dense<0.000000e+00> : vector<16x8xf32>
    %51 = tpu.matmul %50, %38, %cst_17 {dimension_numbers = #tpu.dot_dimension_numbers<[1], [0], [0], [1], [0, 0, 1, 1], [], []>} : vector<16x16xbf16>, vector<16x8xbf16>, vector<16x8xf32> -> vector<16x8xf32>
    %52 = arith.truncf %51 : vector<16x8xf32> to vector<16x8xbf16>
    %53 = vector.extract_strided_slice %1 {offsets = [1, 0, 0], sizes = [1, 8, 32], strides = [1, 1, 1]} : vector<4x8x32xbf16> to vector<1x8x32xbf16>
    %54 = vector.shape_cast %53 : vector<1x8x32xbf16> to vector<8x32xbf16>
    %cst_18 = arith.constant dense<0.000000e+00> : vector<16x32xf32>
    %55 = tpu.matmul %52, %54, %cst_18 {dimension_numbers = #tpu.dot_dimension_numbers<[1], [0], [0], [1], [0, 0, 1, 1], [], []>} : vector<16x8xbf16>, vector<8x32xbf16>, vector<16x32xf32> -> vector<16x32xf32>
    %56 = arith.addf %32, %55 : vector<16x32xf32>
    %57 = vector.extract_strided_slice %8 {offsets = [0, 16], sizes = [16, 8], strides = [1, 1]} : vector<16x96xf32> to vector<16x8xf32>
    %58 = arith.truncf %57 : vector<16x8xf32> to vector<16x8xbf16>
    %59 = vector.extract_strided_slice %8 {offsets = [0, 48], sizes = [16, 8], strides = [1, 1]} : vector<16x96xf32> to vector<16x8xf32>
    %60 = arith.truncf %59 : vector<16x8xf32> to vector<16x8xbf16>
    %61 = vector.extract_strided_slice %8 {offsets = [0, 80], sizes = [16, 8], strides = [1, 1]} : vector<16x96xf32> to vector<16x8xf32>
    %62 = arith.truncf %61 : vector<16x8xf32> to vector<16x8xbf16>
    %cst_19 = arith.constant dense<0.000000e+00> : vector<16x16xf32>
    %63 = tpu.matmul %58, %60, %cst_19 {dimension_numbers = #tpu.dot_dimension_numbers<[1], [1], [0], [0], [0, 0, 1, 0], [], []>} : vector<16x8xbf16>, vector<16x8xbf16>, vector<16x16xf32> -> vector<16x16xf32>
    %cst_20 = arith.constant dense<0xFF800000> : vector<16xf32>
    %64 = vector.multi_reduction <maximumf>, %63, %cst_20 [1] : vector<16x16xf32> to vector<16xf32>
    %65 = vector.shape_cast %64 : vector<16xf32> to vector<16x1xf32>
    %66 = vector.broadcast %65 : vector<16x1xf32> to vector<16x16xf32>
    %67 = arith.subf %63, %66 : vector<16x16xf32>
    %68 = math.exp %67 : vector<16x16xf32>
    %cst_21 = arith.constant dense<0.000000e+00> : vector<16xf32>
    %69 = vector.multi_reduction <add>, %68, %cst_21 [1] : vector<16x16xf32> to vector<16xf32>
    %70 = vector.shape_cast %69 : vector<16xf32> to vector<16x1xf32>
    %71 = tpu.reciprocal %70 : vector<16x1xf32> -> vector<16x1xf32>
    %72 = vector.broadcast %71 : vector<16x1xf32> to vector<16x16xf32>
    %73 = arith.mulf %68, %72 : vector<16x16xf32>
    %74 = arith.truncf %73 : vector<16x16xf32> to vector<16x16xbf16>
    %cst_22 = arith.constant dense<0.000000e+00> : vector<16x8xf32>
    %75 = tpu.matmul %74, %62, %cst_22 {dimension_numbers = #tpu.dot_dimension_numbers<[1], [0], [0], [1], [0, 0, 1, 1], [], []>} : vector<16x16xbf16>, vector<16x8xbf16>, vector<16x8xf32> -> vector<16x8xf32>
    %76 = arith.truncf %75 : vector<16x8xf32> to vector<16x8xbf16>
    %77 = vector.extract_strided_slice %1 {offsets = [2, 0, 0], sizes = [1, 8, 32], strides = [1, 1, 1]} : vector<4x8x32xbf16> to vector<1x8x32xbf16>
    %78 = vector.shape_cast %77 : vector<1x8x32xbf16> to vector<8x32xbf16>
    %cst_23 = arith.constant dense<0.000000e+00> : vector<16x32xf32>
    %79 = tpu.matmul %76, %78, %cst_23 {dimension_numbers = #tpu.dot_dimension_numbers<[1], [0], [0], [1], [0, 0, 1, 1], [], []>} : vector<16x8xbf16>, vector<8x32xbf16>, vector<16x32xf32> -> vector<16x32xf32>
    %80 = arith.addf %56, %79 : vector<16x32xf32>
    %81 = vector.extract_strided_slice %8 {offsets = [0, 24], sizes = [16, 8], strides = [1, 1]} : vector<16x96xf32> to vector<16x8xf32>
    %82 = arith.truncf %81 : vector<16x8xf32> to vector<16x8xbf16>
    %83 = vector.extract_strided_slice %8 {offsets = [0, 56], sizes = [16, 8], strides = [1, 1]} : vector<16x96xf32> to vector<16x8xf32>
    %84 = arith.truncf %83 : vector<16x8xf32> to vector<16x8xbf16>
    %85 = vector.extract_strided_slice %8 {offsets = [0, 88], sizes = [16, 8], strides = [1, 1]} : vector<16x96xf32> to vector<16x8xf32>
    %86 = arith.truncf %85 : vector<16x8xf32> to vector<16x8xbf16>
    %cst_24 = arith.constant dense<0.000000e+00> : vector<16x16xf32>
    %87 = tpu.matmul %82, %84, %cst_24 {dimension_numbers = #tpu.dot_dimension_numbers<[1], [1], [0], [0], [0, 0, 1, 0], [], []>} : vector<16x8xbf16>, vector<16x8xbf16>, vector<16x16xf32> -> vector<16x16xf32>
    %cst_25 = arith.constant dense<0xFF800000> : vector<16xf32>
    %88 = vector.multi_reduction <maximumf>, %87, %cst_25 [1] : vector<16x16xf32> to vector<16xf32>
    %89 = vector.shape_cast %88 : vector<16xf32> to vector<16x1xf32>
    %90 = vector.broadcast %89 : vector<16x1xf32> to vector<16x16xf32>
    %91 = arith.subf %87, %90 : vector<16x16xf32>
    %92 = math.exp %91 : vector<16x16xf32>
    %cst_26 = arith.constant dense<0.000000e+00> : vector<16xf32>
    %93 = vector.multi_reduction <add>, %92, %cst_26 [1] : vector<16x16xf32> to vector<16xf32>
    %94 = vector.shape_cast %93 : vector<16xf32> to vector<16x1xf32>
    %95 = tpu.reciprocal %94 : vector<16x1xf32> -> vector<16x1xf32>
    %96 = vector.broadcast %95 : vector<16x1xf32> to vector<16x16xf32>
    %97 = arith.mulf %92, %96 : vector<16x16xf32>
    %98 = arith.truncf %97 : vector<16x16xf32> to vector<16x16xbf16>
    %cst_27 = arith.constant dense<0.000000e+00> : vector<16x8xf32>
    %99 = tpu.matmul %98, %86, %cst_27 {dimension_numbers = #tpu.dot_dimension_numbers<[1], [0], [0], [1], [0, 0, 1, 1], [], []>} : vector<16x16xbf16>, vector<16x8xbf16>, vector<16x8xf32> -> vector<16x8xf32>
    %100 = arith.truncf %99 : vector<16x8xf32> to vector<16x8xbf16>
    %101 = vector.extract_strided_slice %1 {offsets = [3, 0, 0], sizes = [1, 8, 32], strides = [1, 1, 1]} : vector<4x8x32xbf16> to vector<1x8x32xbf16>
    %102 = vector.shape_cast %101 : vector<1x8x32xbf16> to vector<8x32xbf16>
    %cst_28 = arith.constant dense<0.000000e+00> : vector<16x32xf32>
    %103 = tpu.matmul %100, %102, %cst_28 {dimension_numbers = #tpu.dot_dimension_numbers<[1], [0], [0], [1], [0, 0, 1, 1], [], []>} : vector<16x8xbf16>, vector<8x32xbf16>, vector<16x32xf32> -> vector<16x32xf32>
    %104 = arith.addf %80, %103 : vector<16x32xf32>
    %c0_29 = arith.constant 0 : index
    %c0_30 = arith.constant 0 : index
    %c0_31 = arith.constant 0 : index
    %105 = vector.load %arg5[%c0_29, %c0_30, %c0_31] : memref<1x16x32xf32, #tpu.memory_space<vmem>>, vector<1x16x32xf32>
    %106 = vector.shape_cast %105 : vector<1x16x32xf32> to vector<16x32xf32>
    %107 = vector.shape_cast %104 : vector<16x32xf32> to vector<1x16x32xf32>
    tpu.vector_store %arg5[%c0_29, %c0_30, %c0_31], %107 {strides = array<i32>} : memref<1x16x32xf32, #tpu.memory_space<vmem>>, vector<1x16x32xf32>,
    return
  }
  func.func @transform_0(%arg0: i32) -> (i32, i32, i32) {
    %c0_i32 = arith.constant 0 : i32
    %c0_i32_0 = arith.constant 0 : i32
    %c0_i32_1 = arith.constant 0 : i32
    return %arg0, %c0_i32, %c0_i32_0 : i32, i32, i32
  }
  func.func @transform_1(%arg0: i32) -> (i32, i32) {
    %c0_i32 = arith.constant 0 : i32
    %c0_i32_0 = arith.constant 0 : i32
    %c0_i32_1 = arith.constant 0 : i32
    return %c0_i32, %c0_i32_0 : i32, i32
  }
  func.func @transform_2(%arg0: i32) -> (i32, i32, i32) {
    %c0_i32 = arith.constant 0 : i32
    %c0_i32_0 = arith.constant 0 : i32
    %c0_i32_1 = arith.constant 0 : i32
    %c0_i32_2 = arith.constant 0 : i32
    return %c0_i32, %c0_i32_0, %c0_i32_1 : i32, i32, i32
  }
  func.func @transform_3(%arg0: i32) -> (i32, i32) {
    %c0_i32 = arith.constant 0 : i32
    %c0_i32_0 = arith.constant 0 : i32
    %c0_i32_1 = arith.constant 0 : i32
    return %c0_i32, %c0_i32_0 : i32, i32
  }
  func.func @transform_4(%arg0: i32) -> (i32, i32, i32) {
    %c0_i32 = arith.constant 0 : i32
    %c0_i32_0 = arith.constant 0 : i32
    %c0_i32_1 = arith.constant 0 : i32
    return %arg0, %c0_i32, %c0_i32_0 : i32, i32, i32
  }
}

</mosaic_0001>

<bundles_post_ra>
// kernel: attention_forward.1
= control target key start
LH: loop header
LB: loop body
LE: loop exit
PB: predicated region body
PF: predicated region fallthrough
CT: control target
= control target key end

     0   :  { %9 = vsyncpa [#allocation3], 0  ;;  %s1937_s0 = inlined_call_operand.hbm [shape: f32[2,16,32], index: 0, kind: input, shape index: {}]   ;;  %s1938_s1 = inlined_call_operand.hbm [shape: bf16[32,96], index: 1, kind: input, shape index: {}]   ;;  %s1939_s2 = inlined_call_operand.hbm [shape: bf16[4,8,32], index: 2, kind: input, shape index: {}]   ;;  %s1940_s3 = inlined_call_operand.vmem [shape: f32[1,32], index: 3, kind: input, shape index: {}]   ;;  %s1941_s4 = inlined_call_operand.hbm [shape: f32[2,16,32], index: 4, kind: output, shape index: {}]  }
   0x1   :  { %11 = vsyncpa [#allocation3 + $0x1], 0 }
   0x2   :  { %12 = vsyncpa [#allocation6], 0 }
   0x3   :  { %13 = vsyncpa [#allocation4], 0 }
   0x4   :  { %15 = vsyncpa [#allocation4 + $0x1], 0  ;;  %s1599_s15 = smov 0   ;;  %s1601_s16 = smov 0  }
   0x5   :  { %s1603_s17 = smov 0   ;;  %s1605_s18 = smov 0  }
   0x6 LB: > { %s1620_s19 = sadd.s32 4294967295, %s1549_s18   ;;  %s1116_s20 = sadd.s32 4294967294, %s1549_s18   ;;  %s1549_s18 = sphi %s1605_s18, %s1961_s18   ;;  %s1545_s17 = sphi %s1603_s17, %s1960_s17   ;;  %s1541_s16 = sphi %s1601_s16, %s1959_s16   ;;  %s1537_s15 = sphi %s1599_s15, %s1958_s15  }
   0x7   : > { %p41_p0 = scmp.ne.s32.totalorder %s1541_s16, %s1537_s15  ;;  %p1942_p1 = scmp.eq.s32.totalorder %s1620_s19, 0 }
   0x8   : > { %p134_p3 = scmp.eq.s32.totalorder %s1116_s20, 1  ;;  %p1117_p5 = scmp.ge.s32.totalorder %s1549_s18, 1 }
   0x9   : > { %p1629_p4 = por %p1942_p1, %p41_p0  ;;  %p141_p7 = scmp.lt.s32.totalorder %s1549_s18, 3 }
   0xa   : > { %p1634_p6 = por %p134_p3, %p41_p0  ;;  %s1551_s24 = smov [#allocation5]  }
   0xb   : > { %s1945_s21 = scalar_select %p1629_p4, 1, 0 }
   0xc   : > { %s1946_s22 = scalar_select %p1634_p6, 1, 0 }
   0xd   : > { %p1639_p8 = pnand %p1117_p5, %p141_p7  ;;  %s153_s25 = sshll.u32 %s1551_s24, 4  ;;  %s1643_s25 = int_to_ptr.vmem [resolvable:$true] %s153_s25 }
   0xe   : > { %s1552_s27 = smov [#allocation7]   ;;  %s1393_s5 = scalar_lea.hbm %s1938_s1, 256 }
   0xf   : > { %p1285_p9 = pneg %p1639_p8  ;;  %s166_s28 = sshll.u32 %s1552_s27, 4  ;;  %s1654_s28 = int_to_ptr.vmem [resolvable:$true] %s166_s28 }
  0x10   : > { %p1394_p12 = scmp.ne.s32.totalorder %s1938_s1, %s1393_s5  ;;  %p1400_p5 = scmp.lt.u32.totalorder %s1393_s5, %s1938_s1 }
  0x11   : > { %p1650_p11 = pnand %p1285_p9, %p1942_p1 }
  0x13   : > { %p1395_p13 = pneg %p1650_p11 }
  0x15   : > { %p1396_p0 = pnand %p1395_p13, %p1394_p12 }
  0x17   : > { %p1397_p3 = pneg %p1396_p0 }
  0x19   : > { %p1402_p7 = pnand %p1400_p5, %p1397_p3 }
  0x1b   : > { %1405 = shalt.err (!%p1402_p7)
}
  0x1c   : > { %s1406_s10 = scalar_lea.vmem %s1643_s25, 256  ;;  %p1414_p2 = scmp.lt.s32.totalorder %s1643_s25, %s1643_s25 }
  0x1d   : > { %p1407_p9 = scmp.ne.s32.totalorder %s1643_s25, %s1406_s10  ;;  %p1415_p12 = scmp.lt.s32.totalorder %s1406_s10, %s1406_s10 }
  0x1f   : > { %p1409_p10 = pnand %p1407_p9, %p1395_p13  ;;  %p1416_p0 = por %p1415_p12, %p1414_p2 }
  0x21   : > { %p1410_p1 = pneg %p1409_p10 }
  0x23   : > { %p1417_p6 = pnand %p1416_p0, %p1410_p1 }
  0x25   : > { %1420 = shalt.err (!%p1417_p6)
}
  0x26   : > { %s1553_s11 = smov 64   ;;  %s1554_s12 = smov 4  }
  0x27   : > { %1288 = dma.hbm_to_vmem [thread:$0]  (!%p1650_p11), %s1938_s1, 256, %s1643_s25, [#allocation6], %s1553_s11, %s1553_s11, %s1554_s12  }
  0x28   : > { %s1421_s27 = scalar_lea.hbm %s1939_s2, 256 }
  0x29   : > { %p1422_p2 = scmp.ne.s32.totalorder %s1939_s2, %s1421_s27  ;;  %p1428_p10 = scmp.lt.u32.totalorder %s1421_s27, %s1939_s2 }
  0x2b   : > { %p1424_p1 = pnand %p1422_p2, %p1395_p13 }
  0x2d   : > { %p1425_p6 = pneg %p1424_p1 }
  0x2f   : > { %p1430_p3 = pnand %p1428_p10, %p1425_p6 }
  0x31   : > { %1433 = shalt.err (!%p1430_p3)
}
  0x32   : > { %s1434_s25 = scalar_lea.vmem %s1654_s28, 256  ;;  %p1442_p12 = scmp.lt.s32.totalorder %s1654_s28, %s1654_s28 }
  0x33   : > { %p1435_p5 = scmp.ne.s32.totalorder %s1654_s28, %s1434_s25  ;;  %p1443_p0 = scmp.lt.s32.totalorder %s1434_s25, %s1434_s25 }
  0x35   : > { %p1437_p7 = pnand %p1435_p5, %p1395_p13  ;;  %p1444_p2 = por %p1443_p0, %p1442_p12 }
  0x37   : > { %p1438_p9 = pneg %p1437_p7 }
  0x39   : > { %p1445_p1 = pnand %p1444_p2, %p1438_p9 }
  0x3b   : > { %1448 = shalt.err (!%p1445_p1)
}
  0x3c   : > { %1291 = dma.hbm_to_vmem [thread:$0]  (!%p1650_p11), %s1939_s2, 256, %s1654_s28, [#allocation6], %s1553_s11, %s1553_s11, %s1554_s12  }
  0x3d   : > { %s1709_s9 = sadd.s32 1, %s1549_s18   ;;  %s28_s26 = sadd.s32 1, %s1545_s17 }
  0x3e   : > { %s25_s10 = ssub.s32 %s1549_s18, %s1709_s9  ;;  %p35_p13 = scmp.ne.s32.totalorder %s1545_s17, %s1541_s16 }
  0x3f   : > { %p26_p6 = scmp.eq.s32.totalorder %s25_s10, 0  ;;  %p36_p10 = scmp.eq.s32.totalorder %s1549_s18, 0 }
  0x40   : > { %p1949_p3 = scmp.eq.s32.totalorder %s1620_s19, 1  ;;  %p1302_p7 = scmp.lt.s32.totalorder %s1549_s18, 2 }
  0x41   : > { %s1725_s14 = scalar_select %p26_p6, %s1545_s17, %s28_s26  }
  0x42   : > { %p1719_p5 = por %p1949_p3, %p35_p13  ;;  %p37_p9 = por %p36_p10, %p35_p13 }
  0x43   : > { %s183_s20 = sand.u32 1, %s1545_s17   ;;  %s1150_s28 = sshll.u32 %s1549_s18, 8 }
  0x44   : > { %s1950_s13 = scalar_select %p1719_p5, 1, 0 }
  0x45   : > { %s1121_s24 = sshll.u32 %s183_s20, 4  ;;  %s1732_s27 = scalar_lea.hbm %s1937_s0, %s1150_s28 }
  0x46   : > { %s187_s29 = scalar_lea.vmem [#allocation2], %s1121_s24  ;;  %p1736_p11 = pnand %p1302_p7, %p37_p9 }
  0x47   : > { %s194_s30 = sshll.u32 %s187_s29, 4  ;;  %s1740_s6 = scalar_lea.sflag [#allocation3], %s183_s20  ;;  %s1734_s30 = int_to_ptr.vmem [resolvable:$true] %s194_s30 }
  0x48   : > { %s1449_s25 = scalar_lea.hbm %s1732_s27, 256  ;;  %p1451_p0 = pneg %p1736_p11 }
  0x49   : > { %p1450_p12 = scmp.ne.s32.totalorder %s1732_s27, %s1449_s25  ;;  %s1454_s26 = scalar_lea.hbm %s1937_s0, 512 }
  0x4a   : > { %p1455_p13 = scmp.lt.u32.totalorder %s1732_s27, %s1937_s0  ;;  %p1456_p6 = scmp.lt.u32.totalorder %s1454_s26, %s1449_s25 }
  0x4b   : > { %p1452_p2 = pnand %p1451_p0, %p1450_p12  ;;  %p1458_p3 = scmp.lt.u32.totalorder %s1449_s25, %s1732_s27 }
  0x4c   : > { %p1457_p10 = por %p1456_p6, %p1455_p13 }
  0x4d   : > { %p1453_p1 = pneg %p1452_p2 }
  0x4e   : > { %p1459_p7 = por %p1458_p3, %p1457_p10 }
  0x50   : > { %p1460_p9 = pnand %p1459_p7, %p1453_p1 }
  0x52   : > { %1463 = shalt.err (!%p1460_p9)
}
  0x53   : > { %s1464_s20 = scalar_lea.vmem %s1734_s30, 256  ;;  %s1555_s28 = smov [#allocation2]  }
  0x54   : > { %p1465_p12 = scmp.ne.s32.totalorder %s1734_s30, %s1464_s20  ;;  %s1469_s11 = sshll.u32 %s1555_s28, 4  ;;  %s1470_s11 = int_to_ptr.vmem [resolvable:$false] %s1469_s11 }
  0x55   : > { %s1471_s12 = scalar_lea.vmem %s1470_s11, 512  ;;  %p1472_p4 = scmp.lt.s32.totalorder %s1734_s30, %s1470_s11 }
  0x56   : > { %p1467_p2 = pnand %p1465_p12, %p1451_p0  ;;  %p1473_p13 = scmp.lt.s32.totalorder %s1471_s12, %s1464_s20 }
  0x58   : > { %p1468_p5 = pneg %p1467_p2  ;;  %p1474_p6 = por %p1473_p13, %p1472_p4 }
  0x5a   : > { %p1475_p10 = pnand %p1474_p6, %p1468_p5 }
  0x5c   : > { %1478 = shalt.err (!%p1475_p10)
}
  0x5d   : > { %s1556_s29 = smov 128   ;;  %s1557_s25 = smov 8  }
  0x5e   : > { %1295 = dma.hbm_to_vmem [thread:$0]  (!%p1736_p11), %s1732_s27, 256, %s1734_s30, %s1740_s6, %s1556_s29, %s1556_s29, %s1557_s25  }
  0x5f   : > { %206 = sbr.rel (%p1639_p8) target bundleno = 2522 (0x9da), region = 36  ;;  %s1771_s7 = sand.u32 (!%p1639_p8), 1, %s1541_s16  }
  0x60   : > { %s1125_s8 = sshll.u32 (!%p1639_p8), %s1771_s7, 4  ;;  %s209_s26 = scalar_lea.sflag (!%p1639_p8), [#allocation3], %s1771_s7 }
  0x61   : > { %s212_s10 = scalar_lea.vmem (!%p1639_p8), [#allocation2], %s1125_s8  ;;  %p1952_p4 = scmp.ne.s32.totalorder (!%p1639_p8), %s1945_s21, 0 }
  0x66   : > { %1524 = dma.done.wait (%p1952_p4), %s209_s26, 256  }
  0x67   : > { %1526 = vsyncadd (%p1952_p4), %s209_s26, 4294967040  ;;  %p1953_p5 = scmp.eq.s32.totalorder %s1620_s19, 0 }
  0x69   : > { %1528 = dma.done.wait (%p1953_p5), [#allocation6], 512   ;;  %p1954_p8 = pmov %p1953_p5 }
  0x6a   : > { %v1558_v0 = vmov 0.0   ;;  %vm1559_vm0 = vmmov 0   ;;  %v1359_v1 = vld [vmem:[#allocation5] sm:$0xff]   ;;  %v1360_v2 = vld [vmem:[#allocation5 + $0x8] sm:$0xff]   ;;  %vm276_vm1 = vcmask 261120   ;;  %s1560_s21 = smov 96  }
  0x6b   : > { %1530 = vsyncadd (%p1954_p8), [#allocation6], 4294966784  ;;  %1179 = vmatprep.subr.bf16.mxu0 %v1558_v0  ;;  %1183 = vmatprep.mubr.msk.bf16.mxu0 %vm1559_vm0, %v1558_v0  ;;  %v261_v3 = vld [vmem:[%s212_s10] sm:$0xff]  ;;  %v262_v4 = vld [vmem:[%s212_s10 + $0x8] sm:$0xff]  ;;  %vm325_vm2 = vcmask 64512   ;;  %vm373_vm3 = vcmask 130048  }
  0x6c   : > { %1187 = vmatprep.subr.bf16.mxu1 %v1558_v0  ;;  %1189 = vmatprep.mubr.msk.bf16.mxu1 %vm1559_vm0, %v1558_v0  ;;  %v263_v5 = vpack.c.bf16 %v262_v4, %v261_v3  ;;  %s1561_s23 = smov 64   ;;  %s1562_s27 = smov 80   ;;  %v250_v43 = vld [vmem:[#allocation7] sm:$0xf]  ;;  %vm448_vm4 = vcmask 1043456  }
  0x6d   : > { %1180 = vmatpush3.bf16.msra.mxu0 %v1359_v1  ;;  %s1563_s30 = smov 88   ;;  %s1564_s5 = smov 120   ;;  %v450_v44 = vsel %vm448_vm4, %v250_v43, 0 }
  0x6e   : > { %1181 = vmatprep.subr.bf16.mxu0 %v1558_v0  ;;  %s1565_s6 = smov 112   ;;  %s1566_s24 = smov 72  }
  0x6f   : > { %s1567_s20 = smov 48   ;;  %s1568_s28 = smov 104  }
  0x70   : > { %s1569_s11 = smov 56   ;;  %s1570_s12 = smov 40  }
  0x71   : > { %1182 = vmatpush3.bf16.msra.mxu0 %v1360_v2  ;;  %s244_s26 = scalar_lea.vmem [#allocation8], %s1125_s8  ;;  %p1955_p0 = scmp.ne.s32.totalorder %s1950_s13, 0 }
  0x72   : > { %1193 = vmatprep.subr.bf16.mxu0 %v1558_v0  ;;  %s1024_s10 = sshll.u32 %s244_s26, 4  ;;  %s1886_s10 = int_to_ptr.vmem [resolvable:$true] %s1024_s10 }
  0x73   : > { %s1479_s8 = scalar_lea.vmem %s1886_s10, 256 }
  0x74   : > { %1184 = vmatmul.mubr.msk.bf16.vlgmr.msra.gmra.mrb[0].mxu0 %vm276_vm1, %v263_v5  ;;  %p1480_p11 = scmp.ne.s32.totalorder %s1886_s10, %s1479_s8 }
  0x75   : > { %1195 = vmatprep.mubr.msk.bf16.mxu0 %vm1559_vm0, %v1558_v0 }
  0x76   : > { %p1481_p1 = pnand %p1480_p11, %p1955_p0 }
  0x78   : > { %p1482_p3 = pneg %p1481_p1 }
 0x147   : > { %v314_v6 = vpop.f32.mrb[0].mxu0 }
 0x148   : > { %v1185_v7 = vpop.f32.mrb[1].mxu0 }
 0x149   : > { %v317_v8 = vpop.f32.mrb[2].mxu0 }
 0x14a   : > { %v1796_v9 = vpack.c.bf16 %v317_v8, %v314_v6  ;;  %v1186_v10 = vpop.f32.mrb[3].mxu0 }
 0x14c   : > { %323 = vrot.lane.b32.xlu0 %v1796_v9, %s1560_s21  ;;  %s1151_s21 = sshll.u32 %s1620_s19, 8  ;;  %s1011_s19 = scalar_lea.sflag [#allocation4], %s1771_s7 }
 0x1be   : > { %v324_v11 = vpop.permute.xlu0 %323 }
 0x1bf   : > { %v330_v12 = vsel %vm325_vm2, %v324_v11, 0 }
 0x1c0   : > { %1188 = vmatpush3.bf16.xpose.msra.mxu1 %v330_v12 }
 0x1c1   : > { %1199 = vmatprep.subr.bf16.mxu1 %v1558_v0 }
 0x1c7   : > { %1190 = vmatmul.mubr.msk.bf16.vlgmr.msra.gmra.mrb[0].mxu1 %vm325_vm2, %v1796_v9 }
 0x1c8   : > { %1201 = vmatprep.mubr.msk.bf16.mxu1 %vm1559_vm0, %v1558_v0  ;;  %1200 = vmatpush3.bf16.msra.mxu1 %v450_v44 }
 0x1c9   : > { %1211 = vmatprep.subr.bf16.mxu1 %v1558_v0 }
 0x29a   : > { %v366_v13 = vpop.f32.mrb[0].mxu1 }
 0x29b   : > { %v1191_v14 = vpop.f32.mrb[1].mxu1  ;;  %v374_v15 = vsel %vm373_vm3, %v366_v13, -inf }
 0x29c   : > { %375 = vmax.xlane.f32.xlu0 %v374_v15  ;;  %v369_v16 = vpop.f32.mrb[2].mxu1 }
 0x29d   : > { %v1192_v17 = vpop.f32.mrb[3].mxu1  ;;  %v377_v18 = vsel %vm373_vm3, %v369_v16, -inf }
 0x29e   : > { %378 = vmax.xlane.f32.xlu1 %v377_v18 }
 0x2af   : > { %397 = vrot.lane.b32.xlu1 %v1796_v9, %s1561_s23 }
 0x2b2   : > { %668 = vrot.lane.b32.xlu0 %v1796_v9, %s1562_s27 }
 0x329   : > { %v376_v19 = vpop.xlane.xlu0 %375 }
 0x32a   : > { %v380_v20 = vsub.f32 %v366_v13, %v376_v19 }
 0x32b   : > { %v379_v21 = vpop.xlane.xlu1 %378 }
 0x32c   : > { %v382_v22 = vmul.f32 1.442695, %v380_v20  ;;  %v381_v23 = vsub.f32 %v369_v16, %v379_v21 }
 0x32d   : > { %v669_v39 = vpop.permute.xlu0 %668 }
 0x32e   : > { %1361 = vpow2.f32 %v382_v22  ;;  %v384_v24 = vmul.f32 1.442695, %v381_v23  ;;  %v674_v41 = vsel %vm325_vm2, %v669_v39, 0 }
 0x32f   : > { %v398_v25 = vpop.permute.xlu1 %397 }
 0x330   : > { %1363 = vpow2.f32 %v384_v24  ;;  %1194 = vmatpush3.bf16.msra.mxu0 %v398_v25 }
 0x331   : > { %1205 = vmatprep.subr.bf16.mxu0 %v1558_v0 }
 0x338   : > { %v1362_v26 = vpop.eup %1361 }
 0x339   : > { %v386_v27 = vsel %vm373_vm3, %v1362_v26, 0.0 }
 0x33a   : > { %v1364_v28 = vpop.eup %1363  ;;  %387 = vadd.xlane.f32.xlu1 %v386_v27 }
 0x33b   : > { %v389_v29 = vsel %vm373_vm3, %v1364_v28, 0.0 }
 0x33e   : > { %390 = vadd.xlane.f32.xlu1 %v389_v29 }
 0x34f   : > { %497 = vrot.lane.b32.xlu1 %v1796_v9, %s1563_s30  ;;  %s1891_s30 = scalar_lea.hbm %s1941_s4, %s1151_s21 }
 0x353   : > { %495 = vrot.lane.b32.xlu1 %v1796_v9, %s1564_s5  ;;  %s1571_s5 = smov [#allocation8]  }
 0x357   : > { %666 = vrot.lane.b32.xlu1 %v1796_v9, %s1565_s6  ;;  %s1483_s6 = sshll.u32 %s1571_s5, 4  ;;  %s1484_s6 = int_to_ptr.vmem [resolvable:$false] %s1483_s6 }
 0x358   : > { %p1486_p7 = scmp.lt.s32.totalorder %s1886_s10, %s1484_s6 }
 0x3c7   : > { %v388_v30 = vpop.xlane.xlu1 %387 }
 0x3c8   : > { %1365 = vrcp.f32 %v388_v30 }
 0x3cb   : > { %v391_v31 = vpop.xlane.xlu1 %390 }
 0x3cc   : > { %1367 = vrcp.f32 %v391_v31 }
 0x3cf   : > { %v498_v36 = vpop.permute.xlu1 %497 }
 0x3d0   : > { %v503_v38 = vsel %vm325_vm2, %v498_v36, 0 }
 0x3d2   : > { %v1366_v32 = vpop.eup %1365 }
 0x3d3   : > { %v394_v34 = vmul.f32 %v1366_v32, %v1362_v26  ;;  %v496_v40 = vpop.permute.xlu1 %495 }
 0x3d6   : > { %v1368_v33 = vpop.eup %1367 }
 0x3d7   : > { %v395_v35 = vmul.f32 %v1368_v33, %v1364_v28  ;;  %v667_v42 = vpop.permute.xlu1 %666 }
 0x3d9   : > { %v396_v37 = vpack.c.bf16 %v395_v35, %v394_v34 }
 0x3db   : > { %1196 = vmatmul.mubr.msk.bf16.vlgmr.msra.gmra.mrb[4].mxu0 %vm373_vm3, %v396_v37 }
 0x3dc   : > { %1206 = vmatpush3.bf16.xpose.msra.mxu0 %v503_v38  ;;  %1207 = vmatprep.mubr.msk.bf16.mxu0 %vm1559_vm0, %v1558_v0 }
 0x3dd   : > { %1223 = vmatprep.subr.bf16.mxu0 %v1558_v0 }
 0x3e3   : > { %1208 = vmatmul.mubr.msk.bf16.vlgmr.msra.gmra.mrb[8].mxu0 %vm325_vm2, %v496_v40 }
 0x3e4   : > { %1224 = vmatpush3.bf16.xpose.msra.mxu0 %v674_v41  ;;  %1225 = vmatprep.mubr.msk.bf16.mxu0 %vm1559_vm0, %v1558_v0 }
 0x3e5   : > { %1229 = vmatprep.subr.bf16.mxu0 %v1558_v0 }
 0x3eb   : > { %1226 = vmatmul.mubr.msk.bf16.vlgmr.msra.gmra.mrb[12].mxu0 %vm325_vm2, %v667_v42 }
 0x3ec   : > { %1231 = vmatprep.mubr.msk.bf16.mxu0 %vm1559_vm0, %v1558_v0 }
 0x4ae   : > { %v437_v45 = vpop.f32.mrb[4].mxu0 }
 0x4af   : > { %v1197_v46 = vpop.f32.mrb[5].mxu0 }
 0x4b0   : > { %v440_v47 = vpop.f32.mrb[6].mxu0 }
 0x4b1   : > { %v444_v48 = vpack.c.bf16 %v440_v47, %v437_v45  ;;  %v1198_v49 = vpop.f32.mrb[7].mxu0 }
 0x4b3   : > { %1202 = vmatmul.mubr.msk.bf16.vlgmr.msra.gmra.mrb[4].mxu1 %vm325_vm2, %v444_v48 }
 0x4b4   : > { %1213 = vmatprep.mubr.msk.bf16.mxu1 %vm1559_vm0, %v1558_v0 }
 0x4b6   : > { %v1833_v50 = vpop.f32.mrb[8].mxu0 }
 0x4b7   : > { %v1209_v51 = vpop.f32.mrb[9].mxu0  ;;  %v546_v13 = vsel %vm373_vm3, %v1833_v50, -inf }
 0x4b8   : > { %v542_v52 = vpop.f32.mrb[10].mxu0 }
 0x4b9   : > { %v1210_v53 = vpop.f32.mrb[11].mxu0  ;;  %v549_v60 = vsel %vm373_vm3, %v542_v52, -inf }
 0x4be   : > { %v710_v54 = vpop.f32.mrb[12].mxu0 }
 0x4bf   : > { %v1227_v55 = vpop.f32.mrb[13].mxu0  ;;  %v717_v56 = vsel %vm373_vm3, %v710_v54, -inf }
 0x4c0   : > { %718 = vmax.xlane.f32.xlu1 %v717_v56  ;;  %v713_v57 = vpop.f32.mrb[14].mxu0 }
 0x4c1   : > { %v1228_v58 = vpop.f32.mrb[15].mxu0  ;;  %v720_v59 = vsel %vm373_vm3, %v713_v57, -inf }
 0x4c2   : > { %721 = vmax.xlane.f32.xlu0 %v720_v59 }
 0x4d8   : > { %839 = vrot.lane.b32.xlu0 %v1796_v9, %s1566_s24  ;;  %s1485_s24 = scalar_lea.vmem %s1484_s6, 512 }
 0x4d9   : > { %p1487_p9 = scmp.lt.s32.totalorder %s1485_s24, %s1479_s8 }
 0x4db   : > { %p1488_p12 = por %p1487_p9, %p1486_p7 }
 0x4dd   : > { %p1489_p2 = pnand %p1488_p12, %p1482_p3 }
 0x4f7   : > { %550 = vmax.xlane.f32.xlu0 %v549_v60 }
 0x54d   : > { %v719_v61 = vpop.xlane.xlu1 %718 }
 0x54e   : > { %v723_v62 = vsub.f32 %v710_v54, %v719_v61 }
 0x54f   : > { %v722_v63 = vpop.xlane.xlu0 %721 }
 0x550   : > { %v725_v1 = vmul.f32 1.442695, %v723_v62  ;;  %v724_v2 = vsub.f32 %v713_v57, %v722_v63  ;;  %v252_v63 = vld [vmem:[#allocation7 + $0x8] sm:$0xf] }
 0x552   : > { %1369 = vpow2.f32 %v725_v1  ;;  %v727_v3 = vmul.f32 1.442695, %v724_v2 }
 0x553   : > { %v840_v8 = vpop.permute.xlu0 %839 }
 0x554   : > { %1371 = vpow2.f32 %v727_v3  ;;  %v845_v24 = vsel %vm325_vm2, %v840_v8, 0 }
 0x55c   : > { %v1370_v4 = vpop.eup %1369 }
 0x55d   : > { %v729_v5 = vsel %vm373_vm3, %v1370_v4, 0.0 }
 0x55e   : > { %v1372_v6 = vpop.eup %1371  ;;  %730 = vadd.xlane.f32.xlu1 %v729_v5  ;;  %v792_v5 = vsel %vm448_vm4, %v252_v63, 0 }
 0x55f   : > { %v732_v7 = vsel %vm373_vm3, %v1372_v6, 0.0 }
 0x562   : > { %733 = vadd.xlane.f32.xlu1 %v732_v7 }
 0x573   : > { %740 = vrot.lane.b32.xlu1 %v1796_v9, %s1567_s20 }
 0x577   : > { %837 = vrot.lane.b32.xlu1 %v1796_v9, %s1568_s28 }
 0x584   : > { %v551_v10 = vpop.xlane.xlu0 %550 }
 0x585   : > { %v553_v11 = vsub.f32 %v542_v52, %v551_v10 }
 0x587   : > { %v556_v12 = vmul.f32 1.442695, %v553_v11  ;;  %v253_v11 = vld [vmem:[#allocation7 + $0xc] sm:$0xf] }
 0x589   : > { %1373 = vpow2.f32 %v556_v12 }
 0x593   : > { %v1374_v14 = vpop.eup %1373 }
 0x594   : > { %v561_v15 = vsel %vm373_vm3, %v1374_v14, 0.0 }
 0x59b   : > { %547 = vmax.xlane.f32.xlu1 %v546_v13 }
 0x59f   : > { %562 = vadd.xlane.f32.xlu1 %v561_v15  ;;  %v963_v15 = vsel %vm448_vm4, %v253_v11, 0 }
 0x5eb   : > { %v731_v16 = vpop.xlane.xlu1 %730 }
 0x5ec   : > { %1375 = vrcp.f32 %v731_v16 }
 0x5ef   : > { %v734_v17 = vpop.xlane.xlu1 %733 }
 0x5f0   : > { %1377 = vrcp.f32 %v734_v17 }
 0x5f3   : > { %v741_v18 = vpop.permute.xlu1 %740 }
 0x5f4   : > { %1230 = vmatpush3.bf16.msra.mxu0 %v741_v18 }
 0x5f5   : > { %1241 = vmatprep.subr.bf16.mxu0 %v1558_v0 }
 0x5f6   : > { %v1376_v19 = vpop.eup %1375 }
 0x5f7   : > { %v737_v21 = vmul.f32 %v1376_v19, %v1370_v4  ;;  %v838_v25 = vpop.permute.xlu1 %837 }
 0x5fa   : > { %v1378_v20 = vpop.eup %1377 }
 0x5fb   : > { %v738_v22 = vmul.f32 %v1378_v20, %v1372_v6 }
 0x5fd   : > { %v739_v23 = vpack.c.bf16 %v738_v22, %v737_v21  ;;  %v1129_v21 = vld [vmem:[%s1940_s3] ss:$0 sm:$0xff] }
 0x5ff   : > { %1232 = vmatmul.mubr.msk.bf16.vlgmr.msra.gmra.mrb[16].mxu0 %vm373_vm3, %v739_v23 }
 0x600   : > { %1242 = vmatpush3.bf16.xpose.msra.mxu0 %v845_v24  ;;  %1243 = vmatprep.mubr.msk.bf16.mxu0 %vm1559_vm0, %v1558_v0 }
 0x607   : > { %1244 = vmatmul.mubr.msk.bf16.vlgmr.msra.gmra.mrb[20].mxu0 %vm325_vm2, %v838_v25 }
 0x628   : > { %v548_v26 = vpop.xlane.xlu1 %547 }
 0x629   : > { %v552_v27 = vsub.f32 %v1833_v50, %v548_v26  ;;  %v251_v50 = vld [vmem:[#allocation7 + $0x4] sm:$0xf] }
 0x62a   : > { %v621_v51 = vsel %vm448_vm4, %v251_v50, 0 }
 0x62b   : > { %v554_v28 = vmul.f32 1.442695, %v552_v27 }
 0x62c   : > { %v563_v31 = vpop.xlane.xlu1 %562 }
 0x62d   : > { %1379 = vpow2.f32 %v554_v28 }
 0x62e   : > { %1381 = vrcp.f32 %v563_v31 }
 0x637   : > { %v1380_v29 = vpop.eup %1379 }
 0x638   : > { %v558_v30 = vsel %vm373_vm3, %v1380_v29, 0.0  ;;  %v1382_v34 = vpop.eup %1381 }
 0x639   : > { %559 = vadd.xlane.f32.xlu0 %v558_v30  ;;  %v567_v36 = vmul.f32 %v1382_v34, %v1374_v14 }
 0x64f   : > { %569 = vrot.lane.b32.xlu0 %v1796_v9, %s1569_s11 }
 0x6c6   : > { %v560_v32 = vpop.xlane.xlu0 %559 }
 0x6c7   : > { %1383 = vrcp.f32 %v560_v32 }
 0x6ca   : > { %v570_v33 = vpop.permute.xlu0 %569 }
 0x6cb   : > { %1212 = vmatpush3.bf16.msra.mxu1 %v570_v33 }
 0x6cc   : > { %1217 = vmatprep.subr.bf16.mxu1 %v1558_v0 }
 0x6d1   : > { %v1384_v35 = vpop.eup %1383 }
 0x6d2   : > { %v566_v37 = vmul.f32 %v1384_v35, %v1380_v29  ;;  %v780_v38 = vpop.f32.mrb[16].mxu0 }
 0x6d3   : > { %v1233_v39 = vpop.f32.mrb[17].mxu0 }
 0x6d4   : > { %v783_v40 = vpop.f32.mrb[18].mxu0  ;;  %v568_v41 = vpack.c.bf16 %v567_v36, %v566_v37 }
 0x6d5   : > { %v787_v42 = vpack.c.bf16 %v783_v40, %v780_v38  ;;  %v1234_v43 = vpop.f32.mrb[19].mxu0 }
 0x6d6   : > { %1214 = vmatmul.mubr.msk.bf16.vlgmr.msra.gmra.mrb[8].mxu1 %vm373_vm3, %v568_v41 }
 0x6d7   : > { %1219 = vmatprep.mubr.msk.bf16.mxu1 %vm1559_vm0, %v1558_v0  ;;  %1218 = vmatpush3.bf16.msra.mxu1 %v621_v51 }
 0x6d8   : > { %1235 = vmatprep.subr.bf16.mxu1 %v1558_v0 }
 0x6da   : > { %v881_v44 = vpop.f32.mrb[20].mxu0 }
 0x6db   : > { %v1245_v45 = vpop.f32.mrb[21].mxu0  ;;  %v888_v46 = vsel %vm373_vm3, %v881_v44, -inf }
 0x6dc   : > { %889 = vmax.xlane.f32.xlu1 %v888_v46  ;;  %v884_v47 = vpop.f32.mrb[22].mxu0 }
 0x6dd   : > { %v1246_v48 = vpop.f32.mrb[23].mxu0  ;;  %v891_v49 = vsel %vm373_vm3, %v884_v47, -inf }
 0x6e0   : > { %892 = vmax.xlane.f32.xlu1 %v891_v49 }
 0x769   : > { %v890_v52 = vpop.xlane.xlu1 %889 }
 0x76a   : > { %v894_v53 = vsub.f32 %v881_v44, %v890_v52 }
 0x76c   : > { %v896_v54 = vmul.f32 1.442695, %v894_v53 }
 0x76d   : > { %v893_v55 = vpop.xlane.xlu1 %892 }
 0x76e   : > { %1385 = vpow2.f32 %v896_v54  ;;  %v895_v56 = vsub.f32 %v884_v47, %v893_v55 }
 0x770   : > { %v898_v57 = vmul.f32 1.442695, %v895_v56 }
 0x772   : > { %1387 = vpow2.f32 %v898_v57 }
 0x778   : > { %v1386_v58 = vpop.eup %1385 }
 0x779   : > { %v900_v59 = vsel %vm373_vm3, %v1386_v58, 0.0 }
 0x77a   : > { %901 = vadd.xlane.f32.xlu1 %v900_v59 }
 0x77c   : > { %v1388_v60 = vpop.eup %1387 }
 0x77d   : > { %v903_v61 = vsel %vm373_vm3, %v1388_v60, 0.0 }
 0x77e   : > { %904 = vadd.xlane.f32.xlu1 %v903_v61 }
 0x78f   : > { %911 = vrot.lane.b32.xlu1 %v1796_v9, %s1570_s12 }
 0x7a9   : > { %v609_v62 = vpop.f32.mrb[8].mxu1 }
 0x7aa   : > { %v1215_v1 = vpop.f32.mrb[9].mxu1 }
 0x7ab   : > { %v612_v2 = vpop.f32.mrb[10].mxu1 }
 0x7ac   : > { %v616_v3 = vpack.c.bf16 %v612_v2, %v609_v62  ;;  %v1216_v4 = vpop.f32.mrb[11].mxu1 }
 0x7ae   : > { %1220 = vmatmul.mubr.msk.bf16.vlgmr.msra.gmra.mrb[4].mxu1 %vm325_vm2, %v616_v3 }
 0x7af   : > { %1236 = vmatpush3.bf16.msra.mxu1 %v792_v5  ;;  %1237 = vmatprep.mubr.msk.bf16.mxu1 %vm1559_vm0, %v1558_v0 }
 0x7b0   : > { %1247 = vmatprep.subr.bf16.mxu1 %v1558_v0 }
 0x7ba   : > { %1238 = vmatmul.mubr.msk.bf16.vlgmr.msra.gmra.mrb[4].mxu1 %vm325_vm2, %v787_v42 }
 0x7bb   : > { %1249 = vmatprep.mubr.msk.bf16.mxu1 %vm1559_vm0, %v1558_v0 }
 0x807   : > { %v902_v9 = vpop.xlane.xlu1 %901 }
 0x808   : > { %1389 = vrcp.f32 %v902_v9 }
 0x80b   : > { %v905_v6 = vpop.xlane.xlu1 %904 }
 0x80c   : > { %1391 = vrcp.f32 %v905_v6 }
 0x80f   : > { %v912_v7 = vpop.permute.xlu1 %911 }
 0x810   : > { %1248 = vmatpush3.bf16.msra.mxu1 %v912_v7 }
 0x811   : > { %1253 = vmatprep.subr.bf16.mxu1 %v1558_v0 }
 0x812   : > { %v1390_v8 = vpop.eup %1389 }
 0x813   : > { %v908_v12 = vmul.f32 %v1390_v8, %v1386_v58 }
 0x816   : > { %v1392_v10 = vpop.eup %1391 }
 0x817   : > { %v909_v13 = vmul.f32 %v1392_v10, %v1388_v60 }
 0x819   : > { %v910_v14 = vpack.c.bf16 %v909_v13, %v908_v12 }
 0x81b   : > { %1250 = vmatmul.mubr.msk.bf16.vlgmr.msra.gmra.mrb[12].mxu1 %vm373_vm3, %v910_v14 }
 0x81c   : > { %1254 = vmatpush3.bf16.msra.mxu1 %v963_v15  ;;  %1255 = vmatprep.mubr.msk.bf16.mxu1 %vm1559_vm0, %v1558_v0 }
 0x8ee   : > { %v951_v16 = vpop.f32.mrb[12].mxu1 }
 0x8ef   : > { %v1251_v17 = vpop.f32.mrb[13].mxu1 }
 0x8f0   : > { %v954_v18 = vpop.f32.mrb[14].mxu1 }
 0x8f1   : > { %v958_v19 = vpack.c.bf16 %v954_v18, %v951_v16  ;;  %v1252_v20 = vpop.f32.mrb[15].mxu1 }
 0x8f3   : > { %1256 = vmatmul.mubr.msk.bf16.vlgmr.msra.gmra.mrb[4].mxu1 %vm325_vm2, %v958_v19 }
 0x9c6   : > { %v999_v22 = vpop.f32.mrb[4].mxu1 }
 0x9c7   : > { %v1259_v23 = vadd.f32 %v1129_v21, %v999_v22  ;;  %v1257_v0 = vpop.f32.mrb[5].mxu1 }
 0x9c8   : > { %v1002_v24 = vpop.f32.mrb[6].mxu1 }
 0x9c9   : > { %1008 = vst.msk [vmem:[%s244_s26] sm:$0xff] %vm276_vm1, %v1259_v23  ;;  %v1260_v25 = vadd.f32 %v1129_v21, %v1002_v24  ;;  %v1258_v26 = vpop.f32.mrb[7].mxu1 }
 0x9cb   : > { %1009 = vst.msk [vmem:[%s244_s26 + $0x8] sm:$0xff] %vm276_vm1, %v1260_v25 }
 0x9cc   : > { %1492 = shalt.err (!%p1489_p2)
}
 0x9cd   : > { %s1493_s20 = scalar_lea.hbm %s1891_s30, 256  ;;  %s1497_s12 = scalar_lea.hbm %s1941_s4, 512 }
 0x9ce   : > { %p1494_p13 = scmp.ne.s32.totalorder %s1891_s30, %s1493_s20  ;;  %p1498_p4 = scmp.lt.u32.totalorder %s1891_s30, %s1941_s4 }
 0x9cf   : > { %p1499_p5 = scmp.lt.u32.totalorder %s1497_s12, %s1493_s20  ;;  %p1501_p11 = scmp.lt.u32.totalorder %s1493_s20, %s1891_s30 }
 0x9d0   : > { %p1495_p6 = pnand %p1494_p13, %p1955_p0 }
 0x9d1   : > { %p1500_p8 = por %p1499_p5, %p1498_p4 }
 0x9d2   : > { %p1496_p10 = pneg %p1495_p6 }
 0x9d3   : > { %p1502_p1 = por %p1501_p11, %p1500_p8 }
 0x9d5   : > { %p1503_p3 = pnand %p1502_p1, %p1496_p10 }
 0x9d7   : > { %1506 = shalt.err (!%p1503_p3)
}
 0x9d8   : > { %s1572_s26 = smov 128   ;;  %s1573_s21 = smov 8  }
 0x9d9   : > { %1283 = dma.vmem_to_hbm [thread:$0]  (%p1955_p0), %s1886_s10, 256, %s1891_s30, %s1011_s19, %s1572_s26, %s1572_s26, %s1573_s21  }
 0x9da PF: > { %s1039_s23 = sand.u32 1, %s1537_s15   ;;  %p1956_p7 = scmp.ne.s32.totalorder %s1946_s22, 0 }
 0x9db   : > { %p1957_p9 = scmp.ge.s32.totalorder %s1549_s18, 2  ;;  %s1040_s27 = scalar_lea.sflag [#allocation4], %s1039_s23 }
 0x9dd   : > { %p1297_p12 = pnand %p1957_p9, %p1956_p7 }
 0x9df   : > { %1532 = dma.done.wait (!%p1297_p12), %s1040_s27, 256  }
 0x9e0   : > { %1534 = vsyncadd (!%p1297_p12), %s1040_s27, 4294967040  ;;  %p18_p2 = scmp.ge.s32.totalorder %s1709_s9, 4   ;;  %s1958_s15 = smov %s1541_s16 }
 0x9e1   : > { %s1959_s16 = smov %s1545_s17  ;;  %s1960_s17 = smov %s1725_s14 }
 0x9e2   : > { %s1961_s18 = smov %s1709_s9  ;;  %20 = sbr.rel (!%p18_p2) target bundleno = 6 (0x6), region = 89 }
 0x9e9   :  { %1045 = vsyncpa [#allocation3], 1 }
 0x9ea   :  { %1047 = vsyncpa [#allocation3 + $0x1], 1 }
 0x9eb   :  { %1048 = vsyncpa [#allocation6], 1 }
 0x9ec   :  { %1049 = vsyncpa [#allocation4], 1 }
 0x9ed   :  { %1051 = vsyncpa [#allocation4 + $0x1], 1 }

</bundles_post_ra>
